<compile_context>
chip_gen: v6e
topology: v6e:2x2x1
jax: 0.10.0
libtpu: 0.0.40
codegen_flags: <defaults>
</compile_context>

<pallas_src>
import math

import jax
import jax.numpy as jnp
from jax import lax
from jax.experimental import pallas as pl
from jax.experimental.pallas import tpu as pltpu


_LANE = 128
_VMEM_TILE_BUDGET = 32 * 1024 * 1024   # sizing budget for tiles + resident weights
_VMEM_LIMIT_BYTES = 48 * 1024 * 1024   # raised scoped-VMEM limit (< 64 MiB v7x physical)


def _round_up(n, m):
    return ((n + m - 1) // m) * m


def _gelu_exact(x):
    # Matches torch.nn.GELU() default (erf-based, NOT tanh approximation).
    return 0.5 * x * (1.0 + lax.erf(x * (1.0 / math.sqrt(2.0))))


def adapter_kernel(x_ref, w1_ref, b1_ref, w2_ref, b2_ref, o_ref):
    x = x_ref[...]

    # fc1 + bias + GELU.  Matmul in the input dtype (bf16 stays bf16 on the
    # MXU), accumulation in f32.
    h = jnp.dot(x, w1_ref[...], preferred_element_type=jnp.float32)
    h = _gelu_exact(h + b1_ref[...].astype(jnp.float32))

    # Dropout: eval-mode semantics => identity (deterministic forward).
    # TODO(synk): training-mode dropout (pltpu.prng_seed / stateful_bernoulli) not implemented.

    # fc2 + bias.
    xs = jnp.dot(h.astype(w2_ref.dtype), w2_ref[...],
                 preferred_element_type=jnp.float32)
    xs = xs + b2_ref[...].astype(jnp.float32)

    # Skip connection: f32 add, single cast on store.
    o_ref[...] = (x.astype(jnp.float32) + xs).astype(o_ref.dtype)


def _pick_row_tile(N, D, H_pad, x_dtype, out_dtype, requested):
    """Largest row tile (multiple of the sublane packing) that fits the VMEM budget."""
    isz = jnp.dtype(x_dtype).itemsize
    osz = jnp.dtype(out_dtype).itemsize
    base = 8 * (4 // isz)                      # 8 for f32, 16 for bf16
    # Weights/biases are grid-invariant but Pallas still allocates 2 buffers.
    weight_bytes = 2 * isz * (D * H_pad + H_pad * D + H_pad + D)

    def step_bytes(t):
        # double-buffered x & out tiles + f32 intermediates (h, xs, x_f32)
        return t * (2 * D * isz + 2 * D * osz + 4 * (H_pad + 2 * D))

    tile = _round_up(min(requested, max(N, base)), base)
    while tile > base and weight_bytes + step_bytes(tile) > _VMEM_TILE_BUDGET:
        tile = _round_up(tile // 2, base)
    return tile


def adapter_forward(x, w1, b1, w2, b2, *, row_tile=1024, interpret=False):
    """x: (..., D) with D == w1.shape[0].  Returns same shape/dtype as x."""
    orig_shape = x.shape
    D, H = w1.shape
    assert orig_shape[-1] == D, "feature dim mismatch"

    # Lane-dense hidden dim: zero-pad H to a multiple of 128.  Padded hidden
    # units are exact zeros (GELU(0) = 0, zero W2 rows) => no semantic change.
    H_pad = max(_LANE, _round_up(H, _LANE))
    if H_pad != H:
        w1 = jnp.pad(w1, ((0, 0), (0, H_pad - H)))
        b1 = jnp.pad(b1, (0, H_pad - H))
        w2 = jnp.pad(w2, ((0, H_pad - H), (0, 0)))

    x2d = x.reshape(-1, D)
    N = x2d.shape[0]

    tile = _pick_row_tile(N, D, H_pad, x2d.dtype, x.dtype, row_tile)
    N_pad = _round_up(N, tile)
    if N_pad != N:
        x2d = jnp.pad(x2d, ((0, N_pad - N), (0, 0)))

    b1_2d = b1.reshape(1, H_pad)
    b2_2d = b2.reshape(1, D)

    out = pl.pallas_call(
        adapter_kernel,
        out_shape=jax.ShapeDtypeStruct((N_pad, D), x.dtype),
        grid_spec=pltpu.PrefetchScalarGridSpec(
            num_scalar_prefetch=0,
            grid=(N_pad // tile,),
            in_specs=[
                pl.BlockSpec((tile, D), lambda i: (i, 0)),    # x tile
                pl.BlockSpec((D, H_pad), lambda i: (0, 0)),   # W1 (VMEM-resident)
                pl.BlockSpec((1, H_pad), lambda i: (0, 0)),   # b1
                pl.BlockSpec((H_pad, D), lambda i: (0, 0)),   # W2 (VMEM-resident)
                pl.BlockSpec((1, D), lambda i: (0, 0)),       # b2
            ],
            out_specs=pl.BlockSpec((tile, D), lambda i: (i, 0)),
        ),
        compiler_params=pltpu.CompilerParams(
            dimension_semantics=("parallel",),
            vmem_limit_bytes=_VMEM_LIMIT_BYTES,
        ),
        # Residual kernel: output block index == input block index, so the
        # output can safely reuse x's HBM buffer.
        input_output_aliases={0: 0},
        interpret=interpret,
    )(x2d, w1, b1_2d, w2, b2_2d)

    if N_pad != N:
        out = out[:N]
    return out.reshape(orig_shape)


def init_adapter_params(key, d_features, mlp_ratio=0.25, dtype=jnp.float32):
    d_hidden = int(d_features * mlp_ratio)
    k1, k2, k3, k4 = jax.random.split(key, 4)
    # Deterministic synthetic init (PyTorch-Linear-like uniform bounds).
    bound1 = 1.0 / math.sqrt(d_features)
    bound2 = 1.0 / math.sqrt(d_hidden)
    w1 = jax.random.uniform(k1, (d_features, d_hidden), dtype, -bound1, bound1)
    b1 = jax.random.uniform(k2, (d_hidden,), dtype, -bound1, bound1)
    w2 = jax.random.uniform(k3, (d_hidden, d_features), dtype, -bound2, bound2)
    b2 = jax.random.uniform(k4, (d_features,), dtype, -bound2, bound2)
    return w1, b1, w2, b2


def adapter_reference(x, w1, b1, w2, b2):
    # Pure-JAX reference of the same forward (eval-mode dropout), full-precision dots.
    h = _gelu_exact(jnp.dot(x, w1, precision=lax.Precision.HIGHEST) + b1)
    return x + (jnp.dot(h, w2, precision=lax.Precision.HIGHEST) + b2)


if __name__ == "__main__":
    key = jax.random.PRNGKey(0)
    kx, kp = jax.random.split(key)

    # Small shapes: batch=2, seq=9 (odd -> exercises row padding), D_features=128
    # (mlp_ratio=0.25 -> hidden=32 -> exercises lane padding of H to 128).
    B, T, D = 2, 9, 128
    x = jax.random.normal(kx, (B, T, D), jnp.float32)
    w1, b1, w2, b2 = init_adapter_params(kp, D, mlp_ratio=0.25)

    out = adapter_forward(x, w1, b1, w2, b2)
    out = jax.block_until_ready(out)

    ref = adapter_reference(x, w1, b1, w2, b2)
    assert out.shape == x.shape and out.dtype == x.dtype
    assert jnp.allclose(out, ref, atol=1e-4, rtol=1e-4), "mismatch vs reference"

    print("KERNEL_OK")
</pallas_src>

<mosaic_0001>
module attributes {stable_mosaic.version = 11 : i64} {
  func.func @adapter_kernel(%arg0: i32, %arg1: memref<24x128xf32, #tpu.memory_space<vmem>>, %arg2: memref<128x128xf32, #tpu.memory_space<vmem>>, %arg3: memref<1x128xf32, #tpu.memory_space<vmem>>, %arg4: memref<128x128xf32, #tpu.memory_space<vmem>>, %arg5: memref<1x128xf32, #tpu.memory_space<vmem>>, %arg6: memref<24x128xf32, #tpu.memory_space<vmem>>) attributes {dimension_semantics = [#tpu.dimension_semantics<parallel>], iteration_bounds = array<i64: 1>, scalar_prefetch = 0 : i64, scratch_operands = 0 : i64, tpu.core_type = #tpu.core_type<tc>, window_params = [{transform_indices = @transform_0, window_bounds = array<i64: 24, 128>}, {pipeline_mode = #tpu.pipeline_mode<synchronous>, transform_indices = @transform_1, window_bounds = array<i64: 128, 128>}, {pipeline_mode = #tpu.pipeline_mode<synchronous>, transform_indices = @transform_2, window_bounds = array<i64: 1, 128>}, {pipeline_mode = #tpu.pipeline_mode<synchronous>, transform_indices = @transform_3, window_bounds = array<i64: 128, 128>}, {pipeline_mode = #tpu.pipeline_mode<synchronous>, transform_indices = @transform_4, window_bounds = array<i64: 1, 128>}, {transform_indices = @transform_5, window_bounds = array<i64: 24, 128>}]} {
    %c0 = arith.constant 0 : index
    %c0_0 = arith.constant 0 : index
    %0 = vector.load %arg1[%c0, %c0_0] : memref<24x128xf32, #tpu.memory_space<vmem>>, vector<24x128xf32>
    %c0_1 = arith.constant 0 : index
    %c0_2 = arith.constant 0 : index
    %1 = vector.load %arg2[%c0_1, %c0_2] : memref<128x128xf32, #tpu.memory_space<vmem>>, vector<128x128xf32>
    %cst = arith.constant dense<0.000000e+00> : vector<24x128xf32>
    %2 = tpu.matmul %0, %1, %cst {dimension_numbers = #tpu.dot_dimension_numbers<[1], [0], [0], [1], [0, 0, 1, 1], [], []>} : vector<24x128xf32>, vector<128x128xf32>, vector<24x128xf32> -> vector<24x128xf32>
    %c0_3 = arith.constant 0 : index
    %c0_4 = arith.constant 0 : index
    %3 = vector.load %arg3[%c0_3, %c0_4] : memref<1x128xf32, #tpu.memory_space<vmem>>, vector<1x128xf32>
    %4 = vector.broadcast %3 : vector<1x128xf32> to vector<24x128xf32>
    %5 = arith.addf %2, %4 : vector<24x128xf32>
    %cst_5 = arith.constant 5.000000e-01 : f32
    %6 = vector.broadcast %cst_5 : f32 to vector<24x128xf32>
    %7 = arith.mulf %6, %5 : vector<24x128xf32>
    %cst_6 = arith.constant 0.707106769 : f32
    %8 = vector.broadcast %cst_6 : f32 to vector<24x128xf32>
    %9 = arith.mulf %5, %8 : vector<24x128xf32>
    %10 = math.erf %9 : vector<24x128xf32>
    %cst_7 = arith.constant 1.000000e+00 : f32
    %11 = vector.broadcast %cst_7 : f32 to vector<24x128xf32>
    %12 = arith.addf %11, %10 : vector<24x128xf32>
    %13 = arith.mulf %7, %12 : vector<24x128xf32>
    %c0_8 = arith.constant 0 : index
    %c0_9 = arith.constant 0 : index
    %14 = vector.load %arg4[%c0_8, %c0_9] : memref<128x128xf32, #tpu.memory_space<vmem>>, vector<128x128xf32>
    %cst_10 = arith.constant dense<0.000000e+00> : vector<24x128xf32>
    %15 = tpu.matmul %13, %14, %cst_10 {dimension_numbers = #tpu.dot_dimension_numbers<[1], [0], [0], [1], [0, 0, 1, 1], [], []>} : vector<24x128xf32>, vector<128x128xf32>, vector<24x128xf32> -> vector<24x128xf32>
    %c0_11 = arith.constant 0 : index
    %c0_12 = arith.constant 0 : index
    %16 = vector.load %arg5[%c0_11, %c0_12] : memref<1x128xf32, #tpu.memory_space<vmem>>, vector<1x128xf32>
    %17 = vector.broadcast %16 : vector<1x128xf32> to vector<24x128xf32>
    %18 = arith.addf %15, %17 : vector<24x128xf32>
    %19 = arith.addf %0, %18 : vector<24x128xf32>
    %c0_13 = arith.constant 0 : index
    %c0_14 = arith.constant 0 : index
    %20 = vector.load %arg6[%c0_13, %c0_14] : memref<24x128xf32, #tpu.memory_space<vmem>>, vector<24x128xf32>
    tpu.vector_store %arg6[%c0_13, %c0_14], %19 {strides = array<i32>} : memref<24x128xf32, #tpu.memory_space<vmem>>, vector<24x128xf32>,
    return
  }
  func.func @transform_0(%arg0: i32) -> (i32, i32) {
    %c0_i32 = arith.constant 0 : i32
    %c0_i32_0 = arith.constant 0 : i32
    return %arg0, %c0_i32 : i32, i32
  }
  func.func @transform_1(%arg0: i32) -> (i32, i32) {
    %c0_i32 = arith.constant 0 : i32
    %c0_i32_0 = arith.constant 0 : i32
    %c0_i32_1 = arith.constant 0 : i32
    return %c0_i32, %c0_i32_0 : i32, i32
  }
  func.func @transform_2(%arg0: i32) -> (i32, i32) {
    %c0_i32 = arith.constant 0 : i32
    %c0_i32_0 = arith.constant 0 : i32
    %c0_i32_1 = arith.constant 0 : i32
    return %c0_i32, %c0_i32_0 : i32, i32
  }
  func.func @transform_3(%arg0: i32) -> (i32, i32) {
    %c0_i32 = arith.constant 0 : i32
    %c0_i32_0 = arith.constant 0 : i32
    %c0_i32_1 = arith.constant 0 : i32
    return %c0_i32, %c0_i32_0 : i32, i32
  }
  func.func @transform_4(%arg0: i32) -> (i32, i32) {
    %c0_i32 = arith.constant 0 : i32
    %c0_i32_0 = arith.constant 0 : i32
    %c0_i32_1 = arith.constant 0 : i32
    return %c0_i32, %c0_i32_0 : i32, i32
  }
  func.func @transform_5(%arg0: i32) -> (i32, i32) {
    %c0_i32 = arith.constant 0 : i32
    %c0_i32_0 = arith.constant 0 : i32
    return %arg0, %c0_i32 : i32, i32
  }
}

</mosaic_0001>

<bundles_post_ra>
// kernel: tpu_custom_call.1
= control target key start
LH: loop header
LB: loop body
LE: loop exit
PB: predicated region body
PF: predicated region fallthrough
CT: control target
= control target key end

     0   :  { %10 = vsyncpa [#allocation3], 0  ;;  %s656_s0 = inlined_call_operand.hbm [shape: f32[24,128], index: 0, kind: input, shape index: {}, may-alias: {0,5}]   ;;  %s657_s1 = inlined_call_operand.hbm [shape: f32[128,128], index: 1, kind: input, shape index: {}]   ;;  %s658_s2 = inlined_call_operand.vmem [shape: f32[1,128], index: 2, kind: input, shape index: {}]   ;;  %s659_s3 = inlined_call_operand.hbm [shape: f32[128,128], index: 3, kind: input, shape index: {}]   ;;  %s660_s4 = inlined_call_operand.vmem [shape: f32[1,128], index: 4, kind: input, shape index: {}]   ;;  %s661_s5 = inlined_call_operand.hbm [shape: f32[24,128], index: 5, kind: output, shape index: {}, may-alias: {0,5}]  }
   0x1   :  { %11 = vsyncpa [#allocation6], 0 }
   0x2   :  { %12 = vsyncpa [#allocation4], 0  ;;  %s532_s18 = smov [#allocation5]   ;;  %s533_s20 = smov [#allocation2]  }
   0x3   :  { %s30_s19 = sshll.u32 %s532_s18, 4  ;;  %s18_s21 = sshll.u32 %s533_s20, 4  ;;  %s31_s19 = int_to_ptr.vmem [resolvable:$true] %s30_s19  ;;  %s19_s21 = int_to_ptr.vmem [resolvable:$true] %s18_s21 }
   0x4   :  { %s454_s22 = scalar_lea.vmem %s31_s19, 2048  ;;  %p459_p1 = scmp.lt.s32.totalorder %s31_s19, %s31_s19 }
   0x5   :  { %p455_p0 = scmp.ne.s32.totalorder %s31_s19, %s454_s22  ;;  %p460_p2 = scmp.lt.s32.totalorder %s454_s22, %s454_s22 }
   0x7   :  { %p461_p3 = por %p460_p2, %p459_p1 }
   0x9   :  { %p462_p4 = pnand %p461_p3, %p455_p0 }
   0xb   :  { %465 = shalt.err (!%p462_p4)
}
   0xc   :  { %s534_s23 = smov 128   ;;  %s535_s24 = smov 8  }
   0xd   :  { %36 = dma.hbm_to_vmem [thread:$0]  %s657_s1, 2048, %s31_s19, [#allocation6], %s534_s23, %s534_s23, %s535_s24  }
   0xe   :  { %s474_s27 = scalar_lea.vmem %s19_s21, 384  ;;  %p479_p6 = scmp.lt.s32.totalorder %s19_s21, %s19_s21 }
   0xf   :  { %p475_p5 = scmp.ne.s32.totalorder %s19_s21, %s474_s27  ;;  %p480_p7 = scmp.lt.s32.totalorder %s474_s27, %s474_s27 }
  0x11   :  { %p481_p8 = por %p480_p7, %p479_p6 }
  0x13   :  { %p482_p9 = pnand %p481_p8, %p475_p5 }
  0x15   :  { %485 = shalt.err (!%p482_p9)
}
  0x16   :  { %24 = dma.hbm_to_vmem [thread:$0]  %s656_s0, 384, %s19_s21, [#allocation3], %s534_s23, %s534_s23, %s535_s24  }
  0x17   :  { %s536_s30 = smov [#allocation7]  }
  0x18   :  { %s44_s6 = sshll.u32 %s536_s30, 4  ;;  %s45_s6 = int_to_ptr.vmem [resolvable:$true] %s44_s6 }
  0x19   :  { %s494_s7 = scalar_lea.vmem %s45_s6, 2048  ;;  %p499_p11 = scmp.lt.s32.totalorder %s45_s6, %s45_s6 }
  0x1a   :  { %p495_p10 = scmp.ne.s32.totalorder %s45_s6, %s494_s7  ;;  %p500_p12 = scmp.lt.s32.totalorder %s494_s7, %s494_s7 }
  0x1c   :  { %p501_p13 = por %p500_p12, %p499_p11 }
  0x1e   :  { %p502_p0 = pnand %p501_p13, %p495_p10 }
  0x20   :  { %505 = shalt.err (!%p502_p0)
}
  0x21   :  { %50 = dma.hbm_to_vmem [thread:$0]  %s659_s3, 2048, %s45_s6, [#allocation6], %s534_s23, %s534_s23, %s535_s24  }
  0x22   :  { %526 = dma.done.wait [#allocation3], 384  }
  0x23   :  { %527 = vsyncadd [#allocation3], 4294966912 }
  0x24   :  { %528 = dma.done.wait [#allocation6], 4096  }
  0x25   :  { %529 = vsyncadd [#allocation6], 4294963200  ;;  %v537_v0 = vmov 0.0   ;;  %vm538_vm0 = vmmov 0   ;;  %v80_v1 = vld [vmem:[#allocation5 + $0x78] sm:$0xff]  ;;  %v79_v2 = vld [vmem:[#allocation5 + $0x70] sm:$0xff] }
  0x26   :  { %350 = vmatprep.subr.mxu0 %v537_v0  ;;  %382 = vmatprep.mubr.msk.f32.mxu0 %vm538_vm0, %v537_v0  ;;  %v78_v3 = vld [vmem:[#allocation5 + $0x68] sm:$0xff]  ;;  %v77_v4 = vld [vmem:[#allocation5 + $0x60] sm:$0xff]  ;;  %v76_v5 = vld [vmem:[#allocation5 + $0x58] sm:$0xff]  ;;  %s539_s10 = smov [#allocation8]  }
  0x27   :  { %391 = vmatprep.subr.mxu1 %v537_v0  ;;  %423 = vmatprep.mubr.msk.f32.mxu1 %vm538_vm0, %v537_v0  ;;  %v198_v6 = vld [vmem:[#allocation7 + $0x78] sm:$0xff]  ;;  %v197_v7 = vld [vmem:[#allocation7 + $0x70] sm:$0xff]  ;;  %v196_v9 = vld [vmem:[#allocation7 + $0x68] sm:$0xff]  ;;  %s297_s11 = sshll.u32 %s539_s10, 4  ;;  %s298_s11 = int_to_ptr.vmem [resolvable:$true] %s297_s11 }
  0x28   :  { %351 = vmatpush3.msra.mxu0 %v80_v1  ;;  %392 = vmatpush3.msra.mxu1 %v198_v6  ;;  %v75_v8 = vld [vmem:[#allocation5 + $0x50] sm:$0xff]  ;;  %v74_v10 = vld [vmem:[#allocation5 + $0x48] sm:$0xff]  ;;  %v195_v11 = vld [vmem:[#allocation7 + $0x60] sm:$0xff]  ;;  %p511_p2 = scmp.lt.s32.totalorder %s298_s11, %s298_s11 }
  0x29   :  { %352 = vmatprep.subr.mxu0 %v537_v0  ;;  %393 = vmatprep.subr.mxu1 %v537_v0  ;;  %v73_v12 = vld [vmem:[#allocation5 + $0x40] sm:$0xff]  ;;  %v72_v13 = vld [vmem:[#allocation5 + $0x38] sm:$0xff]  ;;  %v71_v14 = vld [vmem:[#allocation5 + $0x30] sm:$0xff] }
  0x2a   :  { %353 = vmatpush3.msra.mxu0 %v79_v2  ;;  %394 = vmatpush3.msra.mxu1 %v197_v7  ;;  %v70_v15 = vld [vmem:[#allocation5 + $0x28] sm:$0xff]  ;;  %v69_v16 = vld [vmem:[#allocation5 + $0x20] sm:$0xff]  ;;  %v68_v17 = vld [vmem:[#allocation5 + $0x18] sm:$0xff] }
  0x2b   :  { %354 = vmatprep.subr.mxu0 %v537_v0  ;;  %395 = vmatprep.subr.mxu1 %v537_v0  ;;  %v67_v18 = vld [vmem:[#allocation5 + $0x10] sm:$0xff]  ;;  %v66_v19 = vld [vmem:[#allocation5 + $0x8] sm:$0xff]  ;;  %v65_v20 = vld [vmem:[#allocation5] sm:$0xff] }
  0x2c   :  { %355 = vmatpush3.msra.mxu0 %v78_v3  ;;  %396 = vmatpush3.msra.mxu1 %v196_v9  ;;  %v612_v21 = vld [vmem:[#allocation2] sm:$0xff]  ;;  %v618_v22 = vld [vmem:[#allocation2 + $0x8] sm:$0xff]  ;;  %v623_v23 = vld [vmem:[#allocation2 + $0x10] sm:$0xff] }
  0x2d   :  { %356 = vmatprep.subr.mxu0 %v537_v0  ;;  %397 = vmatprep.subr.mxu1 %v537_v0  ;;  %v194_v24 = vld [vmem:[#allocation7 + $0x58] sm:$0xff]  ;;  %v193_v25 = vld [vmem:[#allocation7 + $0x50] sm:$0xff]  ;;  %v192_v26 = vld [vmem:[#allocation7 + $0x48] sm:$0xff] }
  0x2e   :  { %357 = vmatpush3.msra.mxu0 %v77_v4  ;;  %398 = vmatpush3.msra.mxu1 %v195_v11  ;;  %v191_v27 = vld [vmem:[#allocation7 + $0x40] sm:$0xff]  ;;  %v190_v28 = vld [vmem:[#allocation7 + $0x38] sm:$0xff]  ;;  %v189_v29 = vld [vmem:[#allocation7 + $0x30] sm:$0xff] }
  0x2f   :  { %358 = vmatprep.subr.mxu0 %v537_v0  ;;  %399 = vmatprep.subr.mxu1 %v537_v0  ;;  %v188_v30 = vld [vmem:[#allocation7 + $0x28] sm:$0xff]  ;;  %v187_v31 = vld [vmem:[#allocation7 + $0x20] sm:$0xff]  ;;  %v186_v32 = vld [vmem:[#allocation7 + $0x18] sm:$0xff] }
  0x30   :  { %359 = vmatpush3.msra.mxu0 %v76_v5  ;;  %400 = vmatpush3.msra.mxu1 %v194_v24  ;;  %v185_v33 = vld [vmem:[#allocation7 + $0x10] sm:$0xff]  ;;  %v184_v34 = vld [vmem:[#allocation7 + $0x8] sm:$0xff]  ;;  %v183_v35 = vld [vmem:[#allocation7] sm:$0xff] }
  0x31   :  { %360 = vmatprep.subr.mxu0 %v537_v0  ;;  %401 = vmatprep.subr.mxu1 %v537_v0  ;;  %v310_v36 = vld [vmem:[%s658_s2] ss:$0 sm:$0xff] }
  0x32   :  { %361 = vmatpush3.msra.mxu0 %v75_v8  ;;  %402 = vmatpush3.msra.mxu1 %v193_v25  ;;  %v311_v61 = vld [vmem:[%s660_s4] ss:$0 sm:$0xff]  ;;  %s506_s4 = scalar_lea.vmem %s298_s11, 384 }
  0x33   :  { %362 = vmatprep.subr.mxu0 %v537_v0  ;;  %403 = vmatprep.subr.mxu1 %v537_v0  ;;  %p507_p1 = scmp.ne.s32.totalorder %s298_s11, %s506_s4  ;;  %p512_p3 = scmp.lt.s32.totalorder %s506_s4, %s506_s4 }
  0x34   :  { %363 = vmatpush3.msra.mxu0 %v74_v10  ;;  %404 = vmatpush3.msra.mxu1 %v192_v26 }
  0x35   :  { %364 = vmatprep.subr.mxu0 %v537_v0  ;;  %405 = vmatprep.subr.mxu1 %v537_v0  ;;  %p513_p4 = por %p512_p3, %p511_p2 }
  0x36   :  { %365 = vmatpush3.msra.mxu0 %v73_v12  ;;  %406 = vmatpush3.msra.mxu1 %v191_v27 }
  0x37   :  { %366 = vmatprep.subr.mxu0 %v537_v0  ;;  %407 = vmatprep.subr.mxu1 %v537_v0  ;;  %p514_p5 = pnand %p513_p4, %p507_p1 }
  0x38   :  { %367 = vmatpush3.msra.mxu0 %v72_v13  ;;  %408 = vmatpush3.msra.mxu1 %v190_v28 }
  0x39   :  { %368 = vmatprep.subr.mxu0 %v537_v0  ;;  %409 = vmatprep.subr.mxu1 %v537_v0 }
  0x3a   :  { %369 = vmatpush3.msra.mxu0 %v71_v14  ;;  %410 = vmatpush3.msra.mxu1 %v189_v29 }
  0x3b   :  { %370 = vmatprep.subr.mxu0 %v537_v0  ;;  %411 = vmatprep.subr.mxu1 %v537_v0 }
  0x3c   :  { %371 = vmatpush3.msra.mxu0 %v70_v15  ;;  %412 = vmatpush3.msra.mxu1 %v188_v30 }
  0x3d   :  { %372 = vmatprep.subr.mxu0 %v537_v0  ;;  %413 = vmatprep.subr.mxu1 %v537_v0 }
  0x3e   :  { %373 = vmatpush3.msra.mxu0 %v69_v16  ;;  %414 = vmatpush3.msra.mxu1 %v187_v31 }
  0x3f   :  { %374 = vmatprep.subr.mxu0 %v537_v0  ;;  %415 = vmatprep.subr.mxu1 %v537_v0 }
  0x40   :  { %375 = vmatpush3.msra.mxu0 %v68_v17  ;;  %416 = vmatpush3.msra.mxu1 %v186_v32 }
  0x41   :  { %376 = vmatprep.subr.mxu0 %v537_v0  ;;  %417 = vmatprep.subr.mxu1 %v537_v0 }
  0x42   :  { %377 = vmatpush3.msra.mxu0 %v67_v18  ;;  %418 = vmatpush3.msra.mxu1 %v185_v33 }
  0x43   :  { %378 = vmatprep.subr.mxu0 %v537_v0  ;;  %419 = vmatprep.subr.mxu1 %v537_v0 }
  0x44   :  { %379 = vmatpush3.msra.mxu0 %v66_v19  ;;  %420 = vmatpush3.msra.mxu1 %v184_v34 }
  0x45   :  { %380 = vmatprep.subr.mxu0 %v537_v0  ;;  %421 = vmatprep.subr.mxu1 %v537_v0 }
  0x46   :  { %381 = vmatpush3.msra.mxu0 %v65_v20  ;;  %422 = vmatpush3.msra.mxu1 %v183_v35 }
  0x47   :  { %383 = vmatmul.mubr.f32.vlgmr.msra.gmra.mxu0 %v612_v21 }
  0x48   :  { %385 = vmatprep.mubr.msk.f32.mxu0 %vm538_vm0, %v537_v0 }
  0x4b   :  { %386 = vmatmul.mubr.f32.gmra.mxu0 %v618_v22 }
  0x4c   :  { %388 = vmatprep.mubr.msk.f32.mxu0 %vm538_vm0, %v537_v0 }
  0x4f   :  { %389 = vmatmul.mubr.f32.gmra.mxu0 %v623_v23 }
 0x107   :  { %v154_v37 = vpop.f32.mrf.mxu0 }
 0x108   :  { %v155_v38 = vadd.f32 %v310_v36, %v154_v37 }
 0x109   :  { %v384_v39 = vpop.f32.mrf.mxu0 }
 0x10a   :  { %v171_v40 = vmul.f32 0.70710677, %v155_v38  ;;  %v168_v50 = vmul.f32 0.5, %v155_v38 }
 0x10b   :  { %v159_v41 = vpop.f32.mrf.mxu0 }
 0x10c   :  { %440 = verf.f32 %v171_v40  ;;  %v160_v42 = vadd.f32 %v310_v36, %v159_v41 }
 0x10d   :  { %v387_v43 = vpop.f32.mrf.mxu0 }
 0x10e   :  { %v172_v44 = vmul.f32 0.70710677, %v160_v42  ;;  %v169_v54 = vmul.f32 0.5, %v160_v42 }
 0x10f   :  { %v164_v45 = vpop.f32.mrf.mxu0 }
 0x110   :  { %442 = verf.f32 %v172_v44  ;;  %v165_v46 = vadd.f32 %v310_v36, %v164_v45 }
 0x111   :  { %v390_v47 = vpop.f32.mrf.mxu0 }
 0x112   :  { %v173_v48 = vmul.f32 0.70710677, %v165_v46  ;;  %v170_v58 = vmul.f32 0.5, %v165_v46 }
 0x114   :  { %444 = verf.f32 %v173_v48 }
 0x119   :  { %v441_v49 = vpop.eup %440 }
 0x11a   :  { %v177_v51 = vadd.f32 1.0, %v441_v49 }
 0x11c   :  { %v180_v52 = vmul.f32 %v177_v51, %v168_v50 }
 0x11d   :  { %v443_v53 = vpop.eup %442 }
 0x11e   :  { %424 = vmatmul.mubr.f32.vlgmr.msra.gmra.mxu1 %v180_v52  ;;  %v178_v55 = vadd.f32 1.0, %v443_v53 }
 0x11f   :  { %426 = vmatprep.mubr.msk.f32.mxu1 %vm538_vm0, %v537_v0 }
 0x120   :  { %v181_v56 = vmul.f32 %v178_v55, %v169_v54 }
 0x121   :  { %v445_v57 = vpop.eup %444 }
 0x122   :  { %427 = vmatmul.mubr.f32.gmra.mxu1 %v181_v56  ;;  %v179_v59 = vadd.f32 1.0, %v445_v57 }
 0x123   :  { %429 = vmatprep.mubr.msk.f32.mxu1 %vm538_vm0, %v537_v0 }
 0x124   :  { %v182_v60 = vmul.f32 %v179_v59, %v170_v58 }
 0x126   :  { %430 = vmatmul.mubr.f32.gmra.mxu1 %v182_v60 }
 0x1de   :  { %v272_v62 = vpop.f32.mrf.mxu1 }
 0x1df   :  { %v273_v63 = vadd.f32 %v311_v61, %v272_v62 }
 0x1e0   :  { %v425_v1 = vpop.f32.mrf.mxu1 }
 0x1e1   :  { %v286_v2 = vadd.f32 %v273_v63, %v612_v21 }
 0x1e2   :  { %v277_v3 = vpop.f32.mrf.mxu1 }
 0x1e3   :  { %289 = vst [vmem:[#allocation8] sm:$0xff] %v286_v2  ;;  %v278_v4 = vadd.f32 %v311_v61, %v277_v3 }
 0x1e4   :  { %v428_v5 = vpop.f32.mrf.mxu1 }
 0x1e5   :  { %v287_v6 = vadd.f32 %v278_v4, %v618_v22 }
 0x1e6   :  { %v282_v7 = vpop.f32.mrf.mxu1 }
 0x1e7   :  { %290 = vst [vmem:[#allocation8 + $0x8] sm:$0xff] %v287_v6  ;;  %v283_v0 = vadd.f32 %v311_v61, %v282_v7 }
 0x1e8   :  { %v431_v8 = vpop.f32.mrf.mxu1 }
 0x1e9   :  { %v288_v9 = vadd.f32 %v283_v0, %v623_v23 }
 0x1eb   :  { %291 = vst [vmem:[#allocation8 + $0x10] sm:$0xff] %v288_v9 }
 0x1ec   :  { %517 = shalt.err (!%p514_p5)
}
 0x1ed   :  { %303 = dma.vmem_to_hbm [thread:$0]  %s298_s11, 384, %s661_s5, [#allocation4], %s534_s23, %s534_s23, %s535_s24  }
 0x1ee   :  { %530 = dma.done.wait [#allocation4], 384  }
 0x1ef   :  { %531 = vsyncadd [#allocation4], 4294966912 }
 0x1f0   :  { %307 = vsyncpa [#allocation3], 1 }
 0x1f1   :  { %308 = vsyncpa [#allocation6], 1 }
 0x1f2   :  { %309 = vsyncpa [#allocation4], 1 }

</bundles_post_ra>
